<compile_context>
chip_gen: v6e
topology: v6e:2x2x1
jax: 0.10.0
libtpu: 0.0.40
codegen_flags: <defaults>
</compile_context>

<pallas_src>
import functools

import jax
import jax.numpy as jnp
from jax import lax
from jax.experimental import pallas as pl
from jax.experimental.pallas import tpu as pltpu


def _round_up(x, m):
    return ((x + m - 1) // m) * m


# ------------------------------ MaxPool3d(2) ---------------------------------
def maxpool3d_2(x):
    """MaxPool3d(kernel=2, stride=2) as 8-way maximum over strided slices."""
    N, C, D, H, W = x.shape
    D2, H2, W2 = D // 2, H // 2, W // 2
    x = x[:, :, : 2 * D2, : 2 * H2, : 2 * W2]      # floor, like PyTorch for odd dims
    out = x[:, :, 0::2, 0::2, 0::2]
    for kd in range(2):
        for kh in range(2):
            for kw in range(2):
                if kd == kh == kw == 0:
                    continue
                out = jnp.maximum(out, x[:, :, kd::2, kh::2, kw::2])
    return out


# -------------- one-off probe: pin down pltpu.roll rotation direction ---------
@functools.lru_cache(maxsize=None)
def _pltpu_roll_is_nplike():
    """True iff pltpu.roll(x, s, axis)[..., j] == x[..., (j - s) % n] (np.roll)."""
    def k(x_ref, o_ref):
        o_ref[...] = pltpu.roll(x_ref[...], 1, 1)

    x = jnp.arange(8 * 128, dtype=jnp.float32).reshape(8, 128)
    y = pl.pallas_call(k, out_shape=jax.ShapeDtypeStruct((8, 128), jnp.float32))(x)
    return bool(float(y[0, 1]) == 0.0)


# ---------------- Conv3d(3x3x3, pad=1) + BN + ReLU (fused im2col) -------------
def _conv_bn_relu_kernel(xa_ref, xb_ref, w_ref, st_ref, mask_ref, o_ref,
                         *, shifts, margin_r, tm, hw):
    f32 = jnp.float32
    # Tile + right halo: both pieces 128-aligned, width tm + 2*margin_r only.
    xb = xb_ref[0]
    xcat = jnp.concatenate([xa_ref[0], xb[:, :hw]], axis=-1)       # (Cin, tm+hw) bf16

    # im2col patch: every tap = one XLU roll + one aligned block slice.
    rows = []
    for s in shifts:                                # static Python ints (27 taps)
        shifted = xcat if s == 0 else pltpu.roll(xcat, s, 1)
        rows.append(shifted[:, margin_r:margin_r + tm])
    patch = jnp.concatenate(rows, axis=0)                           # (27*Cin, tm) bf16

    # One deep matmul: (Cout, 27*Cin) @ (27*Cin, tm), f32 accumulation on the MXU.
    acc = jnp.dot(w_ref[...], patch, preferred_element_type=f32)    # (Cout, tm)

    scale = st_ref[:, 0:1]                    # (Cout, 1)
    shift = st_ref[:, 1:2]                    # (Cout, 1) — conv bias folded in
    y = jnp.maximum(acc * scale + shift, 0.0) * mask_ref[0]         # zero borders/tail
    o_ref[0] = y.astype(o_ref.dtype)


def conv3d_bn_relu_padded(xpf, dhw, weight, bias, bn_gamma, bn_beta, bn_mean,
                          bn_var, eps=1e-5, tm_max=4096):
    """Conv3d(3x3x3, pad=1) + BatchNorm(eval) + ReLU.

    xpf: (N, Cin, >=Lp) bf16/f32 — zero-padded volume (Dp, Hp, Wp) flattened with
    zero border rows.  Returns (N, Cout, Lp_pad) bf16 in the same padded-grid
    layout (border + tail zeroed), directly consumable by the next conv / PAM.
    """
    # TODO(synk): BatchNorm is eval-mode (running stats); training-mode batch stats not reproduced.
    N, Cin, Lin = xpf.shape
    D, H, W = dhw
    Dp, Hp, Wp = D + 2, H + 2, W + 2
    Lp = Dp * Hp * Wp
    assert Lin >= Lp
    Cout = weight.shape[0]

    margin = Hp * Wp + Wp + 1                  # max |tap offset| in flat coords
    margin_r = _round_up(margin, 128)          # lane-aligned front margin
    hw = 2 * margin_r                          # halo width kept from the next block
    tm = max(min(tm_max, _round_up(Lp, 256)), hw)   # big, 256-aligned spatial tile
    n_tiles = pl.cdiv(Lp, tm)
    Lp_pad = n_tiles * tm
    Le = (n_tiles + 1) * tm                    # extra block so window (i+1) exists
    wlen = tm + hw

    xe = jnp.pad(xpf[:, :, :Lp].astype(jnp.bfloat16),
                 ((0, 0), (0, 0), (margin_r, Le - Lp - margin_r)))

    # Weights stacked along the contraction dim: (Cout, 27*Cin), tap-major.
    wmat = jnp.transpose(weight, (0, 2, 3, 4, 1)).reshape(Cout, 27 * Cin)
    wmat = wmat.astype(jnp.bfloat16)
    # Fold conv bias into the BN affine:  y = (Wx) * scale + shift
    scale = bn_gamma / jnp.sqrt(bn_var + eps)
    shift = bn_beta + (bias - bn_mean) * scale
    st = jnp.stack([scale, shift], axis=1).astype(jnp.float32)      # (Cout, 2)

    # Interior mask on the padded grid (also zeroes the Lp..Lp_pad tail).
    interior = jnp.zeros((Dp, Hp, Wp), jnp.float32).at[1:-1, 1:-1, 1:-1].set(1.0)
    mask = jnp.pad(interior.reshape(-1), (0, Lp_pad - Lp)).reshape(1, 1, Lp_pad)

    offs = tuple((kd - 1) * Hp * Wp + (kh - 1) * Wp + (kw - 1)
                 for kd in range(3) for kh in range(3) for kw in range(3))
    nplike = _pltpu_roll_is_nplike()
    shifts = tuple(((-off if nplike else off) % wlen) for off in offs)

    kern = functools.partial(_conv_bn_relu_kernel, shifts=shifts,
                             margin_r=margin_r, tm=tm, hw=hw)
    out = pl.pallas_call(
        kern,
        out_shape=jax.ShapeDtypeStruct((N, Cout, Lp_pad), jnp.bfloat16),
        grid=(N, n_tiles),
        in_specs=[
            pl.BlockSpec((1, Cin, tm), lambda n, i: (n, 0, i)),       # tile window
            pl.BlockSpec((1, Cin, tm), lambda n, i: (n, 0, i + 1)),   # halo window
            pl.BlockSpec((Cout, 27 * Cin), lambda n, i: (0, 0)),
            pl.BlockSpec((Cout, 2), lambda n, i: (0, 0)),
            pl.BlockSpec((1, 1, tm), lambda n, i: (0, 0, i)),
        ],
        out_specs=pl.BlockSpec((1, Cout, tm), lambda n, i: (n, 0, i)),
        compiler_params=pltpu.CompilerParams(
            dimension_semantics=("parallel", "parallel"),
            vmem_limit_bytes=32 * 1024 * 1024),
    )(xe, xe, wmat, st, mask)
    return out


# ------------------------- PAM (position attention) ---------------------------
def _pam_kernel(x_ref, q_ref, k_ref, v_ref, km_ref, g_ref, o_ref,
                m_sc, l_sc, acc_sc):
    f32 = jnp.float32
    ki = pl.program_id(2)

    @pl.when(ki == 0)
    def _():
        m_sc[...] = jnp.full(m_sc.shape, -1e30, f32)
        l_sc[...] = jnp.zeros(l_sc.shape, f32)
        acc_sc[...] = jnp.zeros(acc_sc.shape, f32)

    q = q_ref[0]                                                    # (Cq, tq) bf16
    k = k_ref[0]                                                    # (Cq, tk) bf16
    v = v_ref[0]                                                    # (C,  tk) bf16

    # energy laid out (tk, tq): keys on sublanes, queries lane-dense.
    energy = lax.dot_general(k, q, (((0,), (0,)), ((), ())),
                             preferred_element_type=f32)            # (tk, tq)
    # Invalid keys (padded-grid border + tail): fill well below the m init so
    # exp(energy - m) underflows to exactly 0 even when a whole block is masked.
    energy = jnp.where(km_ref[...] > 0.0, energy, -1e38)

    m_prev = m_sc[...]
    m_new = jnp.maximum(m_prev, jnp.max(energy, axis=0, keepdims=True))   # (1, tq)
    alpha = jnp.exp(m_prev - m_new)
    p = jnp.exp(energy - m_new)                                     # (tk, tq)
    l_sc[...] = alpha * l_sc[...] + jnp.sum(p, axis=0, keepdims=True)
    acc_sc[...] = alpha * acc_sc[...] + jnp.dot(
        v, p.astype(jnp.bfloat16), preferred_element_type=f32)      # (C, tq)
    m_sc[...] = m_new

    @pl.when(ki == pl.num_programs(2) - 1)
    def _():
        inv_l = pl.reciprocal(l_sc[...], approx=True)               # (1, tq)
        out = g_ref[0] * (acc_sc[...] * inv_l) + x_ref[0].astype(f32)
        o_ref[0] = out.astype(o_ref.dtype)


def pam(y, dhw, wq, bq, wk, bk, wv, bv, gamma, tq=256, tk=256):
    """Position attention consuming the padded-grid layout directly.

    y: (N, C, >= round_up(Lp, 256)) bf16, border/tail positions zero.
    Returns (N, C, La) f32 in the same layout (border queries hold junk and are
    cropped by the caller); border/tail keys are masked out of the softmax.
    """
    N, C, Ly = y.shape
    D, H, W = dhw
    Dp, Hp, Wp = D + 2, H + 2, W + 2
    Lp = Dp * Hp * Wp
    Cq = wq.shape[0]
    La = _round_up(Lp, max(tq, tk))
    assert La <= Ly
    x_a = y[:, :, :La]
    nq, nk = La // tq, La // tk

    # q/k/v 1x1x1 projections hoisted out of the flash loop (computed once).
    wq2 = wq.reshape(Cq, C).astype(jnp.bfloat16)
    wk2 = wk.reshape(Cq, C).astype(jnp.bfloat16)
    wv2 = wv.reshape(C, C).astype(jnp.bfloat16)
    q = (jnp.einsum('oc,ncl->nol', wq2, x_a, preferred_element_type=jnp.float32)
         + bq.reshape(1, Cq, 1)).astype(jnp.bfloat16)
    k = (jnp.einsum('oc,ncl->nol', wk2, x_a, preferred_element_type=jnp.float32)
         + bk.reshape(1, Cq, 1)).astype(jnp.bfloat16)
    v = (jnp.einsum('oc,ncl->nol', wv2, x_a, preferred_element_type=jnp.float32)
         + bv.reshape(1, C, 1)).astype(jnp.bfloat16)

    # Valid-key mask as a (La, 1) column so it broadcasts over (tk, tq) energy.
    interior = jnp.zeros((Dp, Hp, Wp), jnp.float32).at[1:-1, 1:-1, 1:-1].set(1.0)
    km = jnp.pad(interior.reshape(-1), (0, La - Lp)).reshape(La, 1)

    out = pl.pallas_call(
        _pam_kernel,
        out_shape=jax.ShapeDtypeStruct((N, C, La), jnp.float32),
        grid=(N, nq, nk),
        in_specs=[
            pl.BlockSpec((1, C, tq), lambda b, qi, ki: (b, 0, qi)),   # residual
            pl.BlockSpec((1, Cq, tq), lambda b, qi, ki: (b, 0, qi)),  # q
            pl.BlockSpec((1, Cq, tk), lambda b, qi, ki: (b, 0, ki)),  # k
            pl.BlockSpec((1, C, tk), lambda b, qi, ki: (b, 0, ki)),   # v
            pl.BlockSpec((tk, 1), lambda b, qi, ki: (ki, 0)),         # key mask
            pl.BlockSpec(memory_space=pltpu.MemorySpace.SMEM),        # gamma scalar
        ],
        out_specs=pl.BlockSpec((1, C, tq), lambda b, qi, ki: (b, 0, qi)),
        scratch_shapes=[pltpu.VMEM((1, tq), jnp.float32),             # running max
                        pltpu.VMEM((1, tq), jnp.float32),             # running sum
                        pltpu.VMEM((C, tq), jnp.float32)],            # accumulator
        compiler_params=pltpu.CompilerParams(
            dimension_semantics=("parallel", "parallel", "arbitrary"),
            vmem_limit_bytes=32 * 1024 * 1024),
    )(x_a, q, k, v, km, gamma.reshape(1,))
    return out


# ------------------------------- down.forward ---------------------------------
def down_forward(x, p):
    xpool = maxpool3d_2(x)                                  # (N, Cin, D, H, W) f32
    N, Cin, D, H, W = xpool.shape
    Dp, Hp, Wp = D + 2, H + 2, W + 2
    Lp = Dp * Hp * Wp
    # Zero-pad once and flatten in padded coordinates; everything downstream
    # (conv1, conv2, PAM) works in this bf16, channels-major, lane-dense layout.
    xpf = jnp.pad(xpool, ((0, 0), (0, 0), (1, 1), (1, 1), (1, 1))
                  ).reshape(N, Cin, Lp).astype(jnp.bfloat16)
    y = conv3d_bn_relu_padded(xpf, (D, H, W), p["w1"], p["b1"], p["g1"],
                              p["be1"], p["m1"], p["v1"])
    y = conv3d_bn_relu_padded(y, (D, H, W), p["w2"], p["b2"], p["g2"],
                              p["be2"], p["m2"], p["v2"])
    C = y.shape[1]
    out = pam(y, (D, H, W), p["wq"], p["bq"], p["wk"], p["bk"], p["wv"],
              p["bv"], p["gamma"])
    # Single interior crop at the very end.
    out = out[:, :, :Lp].reshape(N, C, Dp, Hp, Wp)[:, :, 1:-1, 1:-1, 1:-1]
    return out


# ------------------------- plain-JAX reference (check) -------------------------
def _conv_ref(x, w, b, g, be, m, v, eps=1e-5):
    y = lax.conv_general_dilated(
        x, w, window_strides=(1, 1, 1), padding=((1, 1), (1, 1), (1, 1)),
        dimension_numbers=("NCDHW", "OIDHW", "NCDHW"),
        precision=lax.Precision.HIGHEST)
    s = (g / jnp.sqrt(v + eps)).reshape(1, -1, 1, 1, 1)
    t = (be - m * (g / jnp.sqrt(v + eps))).reshape(1, -1, 1, 1, 1)
    return jnp.maximum((y + b.reshape(1, -1, 1, 1, 1)) * s + t, 0.0)


def down_reference(x, p):
    N, C, D, H, W = x.shape
    y = x.reshape(N, C, D // 2, 2, H // 2, 2, W // 2, 2).max(axis=(3, 5, 7))
    y = _conv_ref(y, p["w1"], p["b1"], p["g1"], p["be1"], p["m1"], p["v1"])
    y = _conv_ref(y, p["w2"], p["b2"], p["g2"], p["be2"], p["m2"], p["v2"])
    N, C, D, H, W = y.shape
    L = D * H * W
    yf = y.reshape(N, C, L)
    Cq = p["wq"].shape[0]
    q = jnp.einsum('oc,ncl->nol', p["wq"].reshape(Cq, C), yf) + p["bq"].reshape(1, Cq, 1)
    k = jnp.einsum('oc,ncl->nol', p["wk"].reshape(Cq, C), yf) + p["bk"].reshape(1, Cq, 1)
    v = jnp.einsum('oc,ncl->nol', p["wv"].reshape(C, C), yf) + p["bv"].reshape(1, C, 1)
    energy = jnp.einsum('nci,ncj->nij', q, k)
    att = jax.nn.softmax(energy, axis=-1)
    out = jnp.einsum('ncj,nij->nci', v, att)
    out = p["gamma"].reshape(()) * out + yf
    return out.reshape(N, C, D, H, W)


if __name__ == "__main__":
    key = jax.random.PRNGKey(0)
    keys = jax.random.split(key, 16)
    in_ch, out_ch = 4, 16
    N, D, H, W = 2, 8, 16, 16
    Cq = out_ch // 8

    x = jax.random.normal(keys[0], (N, in_ch, D, H, W), jnp.float32)
    params = {
        "w1": 0.1 * jax.random.normal(keys[1], (out_ch, in_ch, 3, 3, 3), jnp.float32),
        "b1": 0.1 * jax.random.normal(keys[2], (out_ch,), jnp.float32),
        "g1": 1.0 + 0.1 * jax.random.normal(keys[3], (out_ch,), jnp.float32),
        "be1": 0.1 * jax.random.normal(keys[4], (out_ch,), jnp.float32),
        "m1": jnp.zeros((out_ch,), jnp.float32),
        "v1": jnp.ones((out_ch,), jnp.float32),
        "w2": 0.1 * jax.random.normal(keys[5], (out_ch, out_ch, 3, 3, 3), jnp.float32),
        "b2": 0.1 * jax.random.normal(keys[6], (out_ch,), jnp.float32),
        "g2": 1.0 + 0.1 * jax.random.normal(keys[7], (out_ch,), jnp.float32),
        "be2": 0.1 * jax.random.normal(keys[8], (out_ch,), jnp.float32),
        "m2": jnp.zeros((out_ch,), jnp.float32),
        "v2": jnp.ones((out_ch,), jnp.float32),
        "wq": 0.1 * jax.random.normal(keys[9], (Cq, out_ch, 1, 1, 1), jnp.float32),
        "bq": 0.1 * jax.random.normal(keys[10], (Cq,), jnp.float32),
        "wk": 0.1 * jax.random.normal(keys[11], (Cq, out_ch, 1, 1, 1), jnp.float32),
        "bk": 0.1 * jax.random.normal(keys[12], (Cq,), jnp.float32),
        "wv": 0.1 * jax.random.normal(keys[13], (out_ch, out_ch, 1, 1, 1), jnp.float32),
        "bv": 0.1 * jax.random.normal(keys[14], (out_ch,), jnp.float32),
        # PyTorch PAM inits gamma to 0 (identity residual); use a nonzero
        # deterministic value so the attention path contributes to the output.
        "gamma": jnp.asarray([0.5], jnp.float32),
    }

    y = down_forward(x, params)
    y = jax.block_until_ready(y)

    y_ref = down_reference(x, params)
    err = float(jnp.max(jnp.abs(y - y_ref)))
    # Tolerance accounts for deliberate bf16 MXU operands / bf16-resident
    # activations (f32 accumulation everywhere) vs. the f32 reference.
    assert jnp.allclose(y, y_ref, atol=5e-2, rtol=5e-2), f"max abs err {err}"
    print("KERNEL_OK")
</pallas_src>

<mosaic_0001>
module attributes {stable_mosaic.version = 11 : i64} {
  func.func @k(%arg0: memref<8x128xf32, #tpu.memory_space<vmem>>, %arg1: memref<8x128xf32, #tpu.memory_space<vmem>>) attributes {dimension_semantics = [], scalar_prefetch = 0 : i64, scratch_operands = 0 : i64, tpu.core_type = #tpu.core_type<tc>} {
    %c0 = arith.constant 0 : index
    %c0_0 = arith.constant 0 : index
    %0 = vector.load %arg0[%c0, %c0_0] : memref<8x128xf32, #tpu.memory_space<vmem>>, vector<8x128xf32>
    %c1_i32 = arith.constant 1 : i32
    %1 = tpu.dynamic_rotate %0 by %c1_i32 dim 1 : vector<8x128xf32>, i32 -> vector<8x128xf32>
    %c0_1 = arith.constant 0 : index
    %c0_2 = arith.constant 0 : index
    %2 = vector.load %arg1[%c0_1, %c0_2] : memref<8x128xf32, #tpu.memory_space<vmem>>, vector<8x128xf32>
    tpu.vector_store %arg1[%c0_1, %c0_2], %1 {strides = array<i32>} : memref<8x128xf32, #tpu.memory_space<vmem>>, vector<8x128xf32>,
    return
  }
}

</mosaic_0001>

<bundles_post_ra>
// kernel: tpu_custom_call.1
= control target key start
LH: loop header
LB: loop body
LE: loop exit
PB: predicated region body
PF: predicated region fallthrough
CT: control target
= control target key end

     0   :  { %6 = vsyncpa [#allocation3], 0  ;;  %s106_s0 = inlined_call_operand.hbm [shape: f32[8,128], index: 0, kind: input, shape index: {}]   ;;  %s107_s1 = inlined_call_operand.hbm [shape: f32[8,128], index: 1, kind: output, shape index: {}]  }
   0x1   :  { %7 = vsyncpa [#allocation4], 0  ;;  %s87_s6 = smov [#allocation2]  }
   0x2   :  { %s14_s7 = sshll.u32 %s87_s6, 4  ;;  %s15_s7 = int_to_ptr.vmem [resolvable:$true] %s14_s7 }
   0x3   :  { %s51_s8 = scalar_lea.vmem %s15_s7, 128  ;;  %p56_p1 = scmp.lt.s32.totalorder %s15_s7, %s15_s7 }
   0x4   :  { %p52_p0 = scmp.ne.s32.totalorder %s15_s7, %s51_s8  ;;  %p57_p2 = scmp.lt.s32.totalorder %s51_s8, %s51_s8 }
   0x6   :  { %p58_p3 = por %p57_p2, %p56_p1 }
   0x8   :  { %p59_p4 = pnand %p58_p3, %p52_p0 }
   0xa   :  { %62 = shalt.err (!%p59_p4)
}
   0xb   :  { %17 = dma.hbm_to_vmem [thread:$0]  %s106_s0, 128, %s15_s7, [#allocation3]  }
   0xc   :  { %83 = dma.done.wait [#allocation3], 128  }
   0xd   :  { %84 = vsyncadd [#allocation3], 4294967168  ;;  %v21_v0 = vld [vmem:[#allocation2] sm:$0xff]  ;;  %s88_s11 = smov 1   ;;  %s89_s12 = smov [#allocation5]  }
   0xe   :  { %22 = vrot.lane.b32.xlu0 %v21_v0, %s88_s11  ;;  %s31_s13 = sshll.u32 %s89_s12, 4  ;;  %s32_s13 = int_to_ptr.vmem [resolvable:$true] %s31_s13 }
   0xf   :  { %s63_s14 = scalar_lea.vmem %s32_s13, 128  ;;  %p68_p6 = scmp.lt.s32.totalorder %s32_s13, %s32_s13 }
  0x10   :  { %p64_p5 = scmp.ne.s32.totalorder %s32_s13, %s63_s14  ;;  %p69_p7 = scmp.lt.s32.totalorder %s63_s14, %s63_s14 }
  0x12   :  { %p70_p8 = por %p69_p7, %p68_p6 }
  0x14   :  { %p71_p9 = pnand %p70_p8, %p64_p5 }
  0x80   :  { %v23_v1 = vpop.permute.xlu0 %22 }
  0x81   :  { %24 = vst [vmem:[#allocation5] sm:$0xff] %v23_v1 }
  0x82   :  { %74 = shalt.err (!%p71_p9)
}
  0x83   :  { %34 = dma.vmem_to_hbm [thread:$0]  %s32_s13, 128, %s107_s1, [#allocation4]  }
  0x84   :  { %85 = dma.done.wait [#allocation4], 128  }
  0x85   :  { %86 = vsyncadd [#allocation4], 4294967168 }
  0x86   :  { %38 = vsyncpa [#allocation3], 1 }
  0x87   :  { %39 = vsyncpa [#allocation4], 1 }

</bundles_post_ra>
